<compile_context>
chip_gen: v7x
topology: tpu7x:2x2x1
jax: 0.10.0
libtpu: 0.0.40
codegen_flags: <defaults>
</compile_context>

<pallas_src>
import jax
import jax.numpy as jnp
from jax.experimental import pallas as pl
from jax.experimental.pallas import tpu as pltpu

PART = 6
LANE = 128


def _round_up(n, m):
    return ((n + m - 1) // m) * m


def pcb_head_kernel(p_ref, w1_ref, b1_ref, w2_ref, b2_ref, out_ref):
    # p_ref : [B, C]       bf16 pooled features of this part (grid axis = part).
    # w1_ref: [C, NB]      bf16, BatchNorm folded in.
    # b1_ref: [1, NB]      f32 , BatchNorm folded in.
    # w2_ref: [NB, CLSP]   bf16, classifier weight (CLSP = class_num padded to 128).
    # b2_ref: [1, CLSP]    f32
    h = jnp.dot(p_ref[...], w1_ref[...],
                preferred_element_type=jnp.float32) + b1_ref[...]       # Linear+BN
    logits = jnp.dot(h.astype(w2_ref.dtype), w2_ref[...],
                     preferred_element_type=jnp.float32) + b2_ref[...]  # classifier
    out_ref[...] = logits.astype(out_ref.dtype)


def pcb_forward(x_nchw, kernel_params, class_num):
    """PCB forward, mode='PCB'.

    Returns a stacked [PART, B, class_num] array; out[i] corresponds to the i-th
    entry of the PyTorch module's returned list y.
    """
    B, C, H, W = x_nchw.shape
    assert H % PART == 0, "H must be divisible by the number of parts"
    hs = H // PART

    # AdaptiveAvgPool2d((PART, 1)) hoisted to XLA on the native NCHW layout.
    pooled = jnp.mean(x_nchw.reshape(B, C, PART, hs, W), axis=(3, 4))   # [B, C, PART]
    pooled = jnp.transpose(pooled, (2, 0, 1)).astype(jnp.bfloat16)      # [PART, B, C]

    w1, b1, w2, b2 = kernel_params
    NB = w1.shape[-1]
    CLSP = w2.shape[-1]

    grid_spec = pl.GridSpec(
        grid=(PART,),
        in_specs=[
            pl.BlockSpec((None, B, C), lambda p: (p, 0, 0)),       # pooled part
            pl.BlockSpec((None, C, NB), lambda p: (p, 0, 0)),      # W1_i (BN folded)
            pl.BlockSpec((None, 1, NB), lambda p: (p, 0, 0)),      # b1_i (BN folded)
            pl.BlockSpec((None, NB, CLSP), lambda p: (p, 0, 0)),   # W2_i
            pl.BlockSpec((None, 1, CLSP), lambda p: (p, 0, 0)),    # b2_i
        ],
        out_specs=pl.BlockSpec((None, B, CLSP), lambda p: (p, 0, 0)),
    )

    out = pl.pallas_call(
        pcb_head_kernel,
        out_shape=jax.ShapeDtypeStruct((PART, B, CLSP), jnp.float32),
        grid_spec=grid_spec,
        compiler_params=pltpu.CompilerParams(
            dimension_semantics=("parallel",)),   # shard parts across TCs on v7x
    )(pooled, w1, b1, w2, b2)

    return out[:, :, :class_num]


def init_raw_params(key, C, NB, CLS, eps=1e-5):
    """Per-part parameters mirroring the PyTorch init fns (f32, unfused)."""
    keys = jax.random.split(key, 3)
    # Linear(C, NB): kaiming_normal mode='fan_out' -> std = sqrt(2 / NB); bias 0
    w1 = jax.random.normal(keys[0], (PART, C, NB), jnp.float32) * jnp.sqrt(2.0 / NB)
    b1 = jnp.zeros((PART, 1, NB), jnp.float32)
    # BatchNorm1d: weight ~ N(1, 0.02), bias 0, running_mean 0, running_var 1 (eval)
    gamma = 1.0 + 0.02 * jax.random.normal(keys[1], (PART, 1, NB), jnp.float32)
    beta = jnp.zeros((PART, 1, NB), jnp.float32)
    running_mean = jnp.zeros((PART, 1, NB), jnp.float32)
    running_var = jnp.ones((PART, 1, NB), jnp.float32)
    bn_scale = gamma / jnp.sqrt(running_var + eps)
    bn_shift = beta - running_mean * bn_scale
    # classifier Linear(NB, CLS): std=0.001, bias 0
    w2 = 0.001 * jax.random.normal(keys[2], (PART, NB, CLS), jnp.float32)
    b2 = jnp.zeros((PART, 1, CLS), jnp.float32)
    return (w1, b1, bn_scale, bn_shift, w2, b2)


def prepare_kernel_params(raw):
    """Fold BN into Linear1, pad class dim to a lane-dense multiple of 128,
    and cast weights to bf16 (biases stay f32)."""
    w1, b1, bns, bnt, w2, b2 = raw
    w1f = w1 * bns                       # broadcast [PART,1,NB] over rows
    b1f = b1 * bns + bnt
    CLS = w2.shape[-1]
    CLSP = _round_up(CLS, LANE)
    pad = CLSP - CLS
    w2p = jnp.pad(w2, ((0, 0), (0, 0), (0, pad)))
    b2p = jnp.pad(b2, ((0, 0), (0, 0), (0, pad)))
    return (w1f.astype(jnp.bfloat16),
            b1f.astype(jnp.float32),
            w2p.astype(jnp.bfloat16),
            b2p.astype(jnp.float32))


def reference(x_nchw, raw):
    """Pure-JAX f32 reference of the unfused forward (pool -> Linear -> BN -> Linear)."""
    B, C, H, W = x_nchw.shape
    hs = H // PART
    w1, b1, bns, bnt, w2, b2 = raw
    pooled = x_nchw.reshape(B, C, PART, hs, W).mean(axis=(3, 4))   # [B, C, PART]
    outs = []
    for i in range(PART):
        p = pooled[:, :, i]                                        # [B, C]
        h = p @ w1[i] + b1[i, 0]
        h = h * bns[i, 0] + bnt[i, 0]
        outs.append(h @ w2[i] + b2[i, 0])
    return outs


if __name__ == "__main__":
    # Small synthetic shapes consistent with the module's conventions:
    # stand-in backbone feature map (real PCB uses C=2048, NB=256), NCHW.
    B, C, H, W = 2, 32, 12, 4        # H divisible by PART=6
    NB, CLS = 32, 8                  # bottleneck / class_num (toy sizes)

    key = jax.random.PRNGKey(0)
    kx, kp = jax.random.split(key)
    x = jax.random.normal(kx, (B, C, H, W), jnp.float32)

    raw = init_raw_params(kp, C, NB, CLS)
    kparams = prepare_kernel_params(raw)

    y = pcb_forward(x, kparams, CLS)          # [PART, B, CLS]
    y = jax.block_until_ready(y)

    y_ref = reference(x, raw)
    for i in range(PART):
        a, b = y[i], y_ref[i]
        assert a.shape == (B, CLS)
        # bf16 weights/activations in the kernel vs. f32 reference -> modest tolerance.
        assert jnp.allclose(a, b, atol=5e-4, rtol=5e-2), f"part {i}: mismatch vs reference"

    print("KERNEL_OK")
</pallas_src>

<mosaic_0001>
module attributes {stable_mosaic.version = 11 : i64} {
  func.func @pcb_head_kernel(%arg0: i32, %arg1: memref<1x2x32xbf16, #tpu.memory_space<vmem>>, %arg2: memref<1x32x32xbf16, #tpu.memory_space<vmem>>, %arg3: memref<1x1x32xf32, #tpu.memory_space<vmem>>, %arg4: memref<1x32x128xbf16, #tpu.memory_space<vmem>>, %arg5: memref<1x1x128xf32, #tpu.memory_space<vmem>>, %arg6: memref<1x2x128xf32, #tpu.memory_space<vmem>>) attributes {dimension_semantics = [#tpu.dimension_semantics<parallel>], iteration_bounds = array<i64: 6>, scalar_prefetch = 0 : i64, scratch_operands = 0 : i64, tpu.core_type = #tpu.core_type<tc>, window_params = [{transform_indices = @transform_0, window_bounds = array<i64: 1, 2, 32>}, {transform_indices = @transform_1, window_bounds = array<i64: 1, 32, 32>}, {transform_indices = @transform_2, window_bounds = array<i64: 1, 1, 32>}, {transform_indices = @transform_3, window_bounds = array<i64: 1, 32, 128>}, {transform_indices = @transform_4, window_bounds = array<i64: 1, 1, 128>}, {transform_indices = @transform_5, window_bounds = array<i64: 1, 2, 128>}]} {
    %c0 = arith.constant 0 : index
    %c0_0 = arith.constant 0 : index
    %c0_1 = arith.constant 0 : index
    %0 = vector.load %arg1[%c0, %c0_0, %c0_1] : memref<1x2x32xbf16, #tpu.memory_space<vmem>>, vector<1x2x32xbf16>
    %1 = vector.shape_cast %0 : vector<1x2x32xbf16> to vector<2x32xbf16>
    %c0_2 = arith.constant 0 : index
    %c0_3 = arith.constant 0 : index
    %c0_4 = arith.constant 0 : index
    %2 = vector.load %arg2[%c0_2, %c0_3, %c0_4] : memref<1x32x32xbf16, #tpu.memory_space<vmem>>, vector<1x32x32xbf16>
    %3 = vector.shape_cast %2 : vector<1x32x32xbf16> to vector<32x32xbf16>
    %cst = arith.constant dense<0.000000e+00> : vector<2x32xf32>
    %4 = tpu.matmul %1, %3, %cst {dimension_numbers = #tpu.dot_dimension_numbers<[1], [0], [0], [1], [0, 0, 1, 1], [], []>} : vector<2x32xbf16>, vector<32x32xbf16>, vector<2x32xf32> -> vector<2x32xf32>
    %c0_5 = arith.constant 0 : index
    %c0_6 = arith.constant 0 : index
    %c0_7 = arith.constant 0 : index
    %5 = vector.load %arg3[%c0_5, %c0_6, %c0_7] : memref<1x1x32xf32, #tpu.memory_space<vmem>>, vector<1x1x32xf32>
    %6 = vector.shape_cast %5 : vector<1x1x32xf32> to vector<1x32xf32>
    %7 = vector.broadcast %6 : vector<1x32xf32> to vector<2x32xf32>
    %8 = arith.addf %4, %7 : vector<2x32xf32>
    %9 = arith.truncf %8 : vector<2x32xf32> to vector<2x32xbf16>
    %c0_8 = arith.constant 0 : index
    %c0_9 = arith.constant 0 : index
    %c0_10 = arith.constant 0 : index
    %10 = vector.load %arg4[%c0_8, %c0_9, %c0_10] : memref<1x32x128xbf16, #tpu.memory_space<vmem>>, vector<1x32x128xbf16>
    %11 = vector.shape_cast %10 : vector<1x32x128xbf16> to vector<32x128xbf16>
    %cst_11 = arith.constant dense<0.000000e+00> : vector<2x128xf32>
    %12 = tpu.matmul %9, %11, %cst_11 {dimension_numbers = #tpu.dot_dimension_numbers<[1], [0], [0], [1], [0, 0, 1, 1], [], []>} : vector<2x32xbf16>, vector<32x128xbf16>, vector<2x128xf32> -> vector<2x128xf32>
    %c0_12 = arith.constant 0 : index
    %c0_13 = arith.constant 0 : index
    %c0_14 = arith.constant 0 : index
    %13 = vector.load %arg5[%c0_12, %c0_13, %c0_14] : memref<1x1x128xf32, #tpu.memory_space<vmem>>, vector<1x1x128xf32>
    %14 = vector.shape_cast %13 : vector<1x1x128xf32> to vector<1x128xf32>
    %15 = vector.broadcast %14 : vector<1x128xf32> to vector<2x128xf32>
    %16 = arith.addf %12, %15 : vector<2x128xf32>
    %c0_15 = arith.constant 0 : index
    %c0_16 = arith.constant 0 : index
    %c0_17 = arith.constant 0 : index
    %17 = vector.load %arg6[%c0_15, %c0_16, %c0_17] : memref<1x2x128xf32, #tpu.memory_space<vmem>>, vector<1x2x128xf32>
    %18 = vector.shape_cast %17 : vector<1x2x128xf32> to vector<2x128xf32>
    %19 = vector.shape_cast %16 : vector<2x128xf32> to vector<1x2x128xf32>
    tpu.vector_store %arg6[%c0_15, %c0_16, %c0_17], %19 {strides = array<i32>} : memref<1x2x128xf32, #tpu.memory_space<vmem>>, vector<1x2x128xf32>,
    return
  }
  func.func @transform_0(%arg0: i32) -> (i32, i32, i32) {
    %c0_i32 = arith.constant 0 : i32
    %c0_i32_0 = arith.constant 0 : i32
    %c0_i32_1 = arith.constant 0 : i32
    return %arg0, %c0_i32, %c0_i32_0 : i32, i32, i32
  }
  func.func @transform_1(%arg0: i32) -> (i32, i32, i32) {
    %c0_i32 = arith.constant 0 : i32
    %c0_i32_0 = arith.constant 0 : i32
    %c0_i32_1 = arith.constant 0 : i32
    return %arg0, %c0_i32, %c0_i32_0 : i32, i32, i32
  }
  func.func @transform_2(%arg0: i32) -> (i32, i32, i32) {
    %c0_i32 = arith.constant 0 : i32
    %c0_i32_0 = arith.constant 0 : i32
    %c0_i32_1 = arith.constant 0 : i32
    return %arg0, %c0_i32, %c0_i32_0 : i32, i32, i32
  }
  func.func @transform_3(%arg0: i32) -> (i32, i32, i32) {
    %c0_i32 = arith.constant 0 : i32
    %c0_i32_0 = arith.constant 0 : i32
    %c0_i32_1 = arith.constant 0 : i32
    return %arg0, %c0_i32, %c0_i32_0 : i32, i32, i32
  }
  func.func @transform_4(%arg0: i32) -> (i32, i32, i32) {
    %c0_i32 = arith.constant 0 : i32
    %c0_i32_0 = arith.constant 0 : i32
    %c0_i32_1 = arith.constant 0 : i32
    return %arg0, %c0_i32, %c0_i32_0 : i32, i32, i32
  }
  func.func @transform_5(%arg0: i32) -> (i32, i32, i32) {
    %c0_i32 = arith.constant 0 : i32
    %c0_i32_0 = arith.constant 0 : i32
    %c0_i32_1 = arith.constant 0 : i32
    return %arg0, %c0_i32, %c0_i32_0 : i32, i32, i32
  }
}

</mosaic_0001>

<bundles_post_ra>
// kernel: tpu_custom_call.1
= control target key start
LH: loop header
LB: loop body
LE: loop exit
PB: predicated region body
PF: predicated region fallthrough
CT: control target
= control target key end

     0   :  { %s1182_s0 = inlined_call_operand.hbm [shape: bf16[6,2,32], index: 0, kind: input, shape index: {}]   ;;  %s1183_s1 = inlined_call_operand.hbm [shape: bf16[6,32,32], index: 1, kind: input, shape index: {}]   ;;  %s1184_s2 = inlined_call_operand.vmem [shape: f32[6,1,32], index: 2, kind: input, shape index: {}]   ;;  %s1185_s3 = inlined_call_operand.hbm [shape: bf16[6,32,128], index: 3, kind: input, shape index: {}]   ;;  %s1186_s4 = inlined_call_operand.vmem [shape: f32[6,1,128], index: 4, kind: input, shape index: {}]   ;;  %s1187_s5 = inlined_call_operand.hbm [shape: f32[6,2,128], index: 5, kind: output, shape index: {}]  }
   0x1   :  { %1196 = sst [smem:[#allocation15_spill]] %s1183_s1 }
   0x2   :  { %10 = vsyncpa [#allocation3], 0 }
   0x3   :  { %12 = vsyncpa [#allocation3 + $0x1], 0 }
   0x4   :  { %13 = vsyncpa [#allocation6], 0 }
   0x5   :  { %15 = vsyncpa [#allocation6 + $0x1], 0 }
   0x6   :  { %16 = vsyncpa [#allocation4], 0 }
   0x7   :  { %18 = vsyncpa [#allocation4 + $0x1], 0  ;;  %s935_s18 = smov 0   ;;  %s937_s19 = smov 0  }
   0x8   :  { %s939_s20 = smov 0   ;;  %s941_s21 = smov 0  }
   0x9 LB: > { %1197 = sst [smem:[#allocation12_spill]] %s891_s20  ;;  %s956_s22 = sadd.s32 4294967295, %s895_s21   ;;  %s895_s21 = sphi %s941_s21, %s1213_s21   ;;  %s891_s20 = sphi %s939_s20, %s1215_s20   ;;  %s887_s19 = sphi %s937_s19, %s1217_s19   ;;  %s883_s18 = sphi %s935_s18, %s1216_s18  }
   0xa   : > { %s621_s23 = sadd.s32 4294967294, %s895_s21   ;;  %s960_s24 = sadd.s32 1, %s895_s21  }
   0xb   : > { %1198 = sst [smem:[#allocation13_spill]] %s960_s24  ;;  %s31_s25 = sadd.s32 1, %s891_s20 }
   0xc   : > { %s28_s26 = ssub.s32 %s895_s21, %s960_s24  ;;  %p38_p0 = scmp.ne.s32.totalorder %s891_s20, %s887_s19 }
   0xd   : > { %p29_p1 = scmp.eq.s32.totalorder %s28_s26, 0  ;;  %p39_p2 = scmp.eq.s32.totalorder %s895_s21, 0 }
   0xe   : > { %p44_p3 = scmp.ne.s32.totalorder %s887_s19, %s883_s18  ;;  %p45_p4 = scmp.eq.s32.totalorder %s956_s22, 0 }
   0xf   : > { %s972_s27 = scalar_select %p29_p1, %s891_s20, %s31_s25  }
  0x10   : > { %p40_p5 = por %p39_p2, %p38_p0  ;;  %p974_p6 = por %p45_p4, %p44_p3 }
  0x11   : > { %1199 = sst [smem:[#allocation14_spill]] %s972_s27  ;;  %p172_p7 = scmp.eq.s32.totalorder %s956_s22, 5 }
  0x12   : > { %s1200_s28 = scalar_select %p974_p6, 1, 0 }
  0x13   : > { %p178_p8 = scmp.eq.s32.totalorder %s621_s23, 5  ;;  %p693_p9 = scmp.lt.s32.totalorder %s895_s21, 6 }
  0x14   : > { %p980_p10 = por %p172_p7, %p38_p0  ;;  %s989_s6 = sand.u32 1, %s891_s20  }
  0x15   : > { %p984_p11 = por %p178_p8, %p44_p3  ;;  %p991_p12 = pnand %p693_p9, %p40_p5 }
  0x16   : > { %s1201_s29 = scalar_select %p980_p10, 1, 0 }
  0x17   : > { %s1202_s30 = scalar_select %p984_p11, 1, 0 }
  0x18   : > { %s1203_s7 = scalar_select %p991_p12, 1, 0 }
  0x19   : > { %s215_s8 = sand.u32 1, %s895_s21   ;;  %s625_s9 = sshll.u32 %s989_s6, 4 }
  0x1a   : > { %s647_s10 = sshll.u32 %s895_s21, 8  ;;  %s1204_s1 = sld [smem:[#allocation15_spill]] }
  0x1b   : > { %s219_s14 = scalar_lea.vmem [#allocation5], %s625_s9  ;;  %s1009_s16 = scalar_lea.sflag [#allocation6], %s215_s8 }
  0x1c   : > { %s226_s15 = sshll.u32 %s219_s14, 4  ;;  %p1015_p0 = pneg %p991_p12  ;;  %s1007_s15 = int_to_ptr.vmem [resolvable:$true] %s226_s15 }
  0x20   : > { %s1003_s13 = scalar_lea.hbm %s1204_s1, %s647_s10  ;;  %s740_s11 = scalar_lea.hbm %s1204_s1, 1536 }
  0x21   : > { %s735_s17 = scalar_lea.hbm %s1003_s13, 256  ;;  %p741_p3 = scmp.lt.u32.totalorder %s1003_s13, %s1204_s1 }
  0x22   : > { %p736_p13 = scmp.ne.s32.totalorder %s1003_s13, %s735_s17  ;;  %p742_p4 = scmp.lt.u32.totalorder %s740_s11, %s735_s17 }
  0x23   : > { %p744_p7 = scmp.lt.u32.totalorder %s735_s17, %s1003_s13 }
  0x24   : > { %p738_p1 = pnand %p1015_p0, %p736_p13  ;;  %p743_p5 = por %p742_p4, %p741_p3 }
  0x26   : > { %p739_p2 = pneg %p738_p1  ;;  %p745_p8 = por %p744_p7, %p743_p5 }
  0x28   : > { %p746_p9 = pnand %p745_p8, %p739_p2 }
  0x2a   : > { %749 = shalt.err (!%p746_p9)
}
  0x2b   : > { %s750_s8 = scalar_lea.vmem %s1007_s15, 256  ;;  %s897_s25 = smov [#allocation5]  }
  0x2c   : > { %p751_p13 = scmp.ne.s32.totalorder %s1007_s15, %s750_s8  ;;  %s755_s26 = sshll.u32 %s897_s25, 4  ;;  %s756_s26 = int_to_ptr.vmem [resolvable:$false] %s755_s26 }
  0x2d   : > { %s757_s12 = scalar_lea.vmem %s756_s26, 512  ;;  %p758_p10 = scmp.lt.s32.totalorder %s1007_s15, %s756_s26 }
  0x2e   : > { %p753_p1 = pnand %p751_p13, %p1015_p0  ;;  %p759_p6 = scmp.lt.s32.totalorder %s757_s12, %s750_s8 }
  0x30   : > { %p754_p11 = pneg %p753_p1  ;;  %p760_p3 = por %p759_p6, %p758_p10 }
  0x32   : > { %p761_p4 = pnand %p760_p3, %p754_p11 }
  0x34   : > { %764 = shalt.err (!%p761_p4)
}
  0x35   : > { %s1193_s17 = smov 64   ;;  %s899_s11 = smov 4  }
  0x36   : > { %685 = dma.hbm_to_vmem [thread:$0]  (!%p991_p12), %s1003_s13, 256, %s1007_s15, %s1009_s16, %s1193_s17, %s1193_s17, %s899_s11  }
  0x37   : > { %s1047_s25 = scalar_lea.hbm %s1185_s3, %s647_s10  ;;  %s246_s26 = scalar_lea.vmem [#allocation7], %s625_s9 }
  0x38   : > { %s253_s12 = sshll.u32 %s246_s26, 4  ;;  %p631_p6 = scmp.ge.s32.totalorder %s895_s21, 1  ;;  %s1063_s12 = int_to_ptr.vmem [resolvable:$true] %s253_s12 }
  0x39   : > { %p267_p10 = scmp.lt.s32.totalorder %s895_s21, 7  ;;  %s624_s1 = sshll.u32 %s895_s21, 4 }
  0x3a   : > { %s1061_s13 = scalar_lea.hbm %s1182_s0, %s624_s1  ;;  %s201_s9 = scalar_lea.vmem [#allocation2], %s989_s6 }
  0x3b   : > { %p1054_p11 = pnand %p631_p6, %p267_p10  ;;  %s208_s10 = sshll.u32 %s201_s9, 4  ;;  %s209_s10 = int_to_ptr.vmem [resolvable:$true] %s208_s10 }
  0x3c   : > { %s199_s15 = scalar_lea.sflag [#allocation3], %s989_s6  ;;  %s765_s14 = scalar_lea.hbm %s1061_s13, 16 }
  0x3d   : > { %s1206_s27 = scalar_select %p1054_p11, 1, 0 }
  0x3e   : > { %p766_p2 = scmp.ne.s32.totalorder %s1061_s13, %s765_s14  ;;  %s770_s1 = scalar_lea.hbm %s1182_s0, 96 }
  0x3f   : > { %p771_p8 = scmp.lt.u32.totalorder %s1061_s13, %s1182_s0  ;;  %p772_p9 = scmp.lt.u32.totalorder %s770_s1, %s765_s14 }
  0x40   : > { %p768_p5 = pnand %p766_p2, %p1015_p0  ;;  %p774_p1 = scmp.lt.u32.totalorder %s765_s14, %s1061_s13 }
  0x41   : > { %p773_p13 = por %p772_p9, %p771_p8 }
  0x42   : > { %p769_p7 = pneg %p768_p5 }
  0x43   : > { %p775_p3 = por %p774_p1, %p773_p13 }
  0x45   : > { %p776_p4 = pnand %p775_p3, %p769_p7 }
  0x47   : > { %779 = shalt.err (!%p776_p4)
}
  0x48   : > { %s780_s6 = scalar_lea.vmem %s209_s10, 16  ;;  %s900_s9 = smov [#allocation2]  }
  0x49   : > { %p781_p6 = scmp.ne.s32.totalorder %s209_s10, %s780_s6  ;;  %s785_s17 = sshll.u32 %s900_s9, 4  ;;  %s786_s17 = int_to_ptr.vmem [resolvable:$false] %s785_s17 }
  0x4a   : > { %s787_s8 = scalar_lea.vmem %s786_s17, 32  ;;  %p788_p5 = scmp.lt.s32.totalorder %s209_s10, %s786_s17 }
  0x4b   : > { %p783_p10 = pnand %p781_p6, %p1015_p0  ;;  %p789_p11 = scmp.lt.s32.totalorder %s787_s8, %s780_s6 }
  0x4d   : > { %p784_p2 = pneg %p783_p10  ;;  %p790_p12 = por %p789_p11, %p788_p5 }
  0x4f   : > { %p791_p8 = pnand %p790_p12, %p784_p2 }
  0x51   : > { %794 = shalt.err (!%p791_p8)
}
  0x52   : > { %p1207_p9 = scmp.ne.s32.totalorder %s1203_s7, 0  ;;  %s795_s14 = scalar_lea.hbm %s1047_s25, 256 }
  0x53   : > { %p796_p7 = scmp.ne.s32.totalorder %s1047_s25, %s795_s14  ;;  %s800_s1 = scalar_lea.hbm %s1185_s3, 1536 }
  0x54   : > { %682 = dma.hbm_to_vmem [thread:$0]  (!%p1207_p9), %s1061_s13, 16, %s209_s10, %s199_s15  }
  0x55   : > { %p798_p13 = pnand %p796_p7, %p1015_p0  ;;  %p801_p12 = scmp.lt.u32.totalorder %s1047_s25, %s1185_s3 }
  0x56   : > { %p802_p11 = scmp.lt.u32.totalorder %s800_s1, %s795_s14  ;;  %p804_p4 = scmp.lt.u32.totalorder %s795_s14, %s1047_s25 }
  0x57   : > { %p799_p1 = pneg %p798_p13 }
  0x58   : > { %p803_p3 = por %p802_p11, %p801_p12 }
  0x5a   : > { %p805_p6 = por %p804_p4, %p803_p3 }
  0x5c   : > { %p806_p10 = pnand %p805_p6, %p799_p1 }
  0x5e   : > { %809 = shalt.err (!%p806_p10)
}
  0x5f   : > { %s810_s13 = scalar_lea.vmem %s1063_s12, 256  ;;  %s901_s10 = smov [#allocation7]  }
  0x60   : > { %p811_p2 = scmp.ne.s32.totalorder %s1063_s12, %s810_s13  ;;  %s815_s15 = sshll.u32 %s901_s10, 4  ;;  %s816_s15 = int_to_ptr.vmem [resolvable:$false] %s815_s15 }
  0x61   : > { %s817_s6 = scalar_lea.vmem %s816_s15, 512  ;;  %p818_p7 = scmp.lt.s32.totalorder %s1063_s12, %s816_s15 }
  0x62   : > { %p813_p5 = pnand %p811_p2, %p1015_p0  ;;  %p819_p13 = scmp.lt.s32.totalorder %s817_s6, %s810_s13 }
  0x64   : > { %p814_p8 = pneg %p813_p5  ;;  %p820_p12 = por %p819_p13, %p818_p7 }
  0x66   : > { %p821_p11 = pnand %p820_p12, %p814_p8 }
  0x68   : > { %824 = shalt.err (!%p821_p11)
}
  0x69   : > { %s1208_s9 = smov 64   ;;  %p1209_p0 = scmp.ne.s32.totalorder %s1206_s27, 0 }
  0x6a   : > { %688 = dma.hbm_to_vmem [thread:$0]  (!%p1207_p9), %s1047_s25, 256, %s1063_s12, %s1009_s16, %s1208_s9, %s1208_s9, %s899_s11  }
  0x6b   : > { %271 = sbr.rel (%p1209_p0) target bundleno = 572 (0x23c), region = 40  ;;  %s1112_s23 = sand.u32 (!%p1209_p0), 1, %s887_s19  }
  0x6c   : > { %s274_s8 = scalar_lea.sflag (!%p1209_p0), [#allocation3], %s1112_s23  ;;  %s276_s14 = scalar_lea.vmem (!%p1209_p0), [#allocation2], %s1112_s23 }
  0x6d   : > { %p1210_p1 = scmp.ne.s32.totalorder (!%p1209_p0), %s1200_s28, 0 }
  0x72   : > { %870 = dma.done.wait (%p1210_p1), %s274_s8, 16  }
  0x73   : > { %872 = vsyncadd (%p1210_p1), %s274_s8, 4294967280  ;;  %s281_s7 = sand.u32 1, %s956_s22   ;;  %s632_s16 = sshll.u32 %s1112_s23, 4 }
  0x74   : > { %s282_s27 = scalar_lea.sflag [#allocation6], %s281_s7  ;;  %s285_s11 = scalar_lea.vmem [#allocation5], %s632_s16 }
  0x75   : > { %874 = dma.done.wait (%p1210_p1), %s282_s27, 512  }
  0x76   : > { %876 = vsyncadd (%p1210_p1), %s282_s27, 4294966784  ;;  %v902_v0 = vmov 0.0   ;;  %vm903_vm0 = vmmov 0   ;;  %v731_v1 = vld [vmem:[%s285_s11] sm:$0xff]   ;;  %v732_v2 = vld [vmem:[%s285_s11 + $0x8] sm:$0xff]   ;;  %s294_s25 = scalar_lea.vmem [#allocation7], %s632_s16 }
  0x77   : > { %655 = vmatprep.subr.bf16.mxu0 %v902_v0  ;;  %659 = vmatprep.mubr.msk.bf16.mxu0 %vm903_vm0, %v902_v0  ;;  %v733_v3 = vld [vmem:[%s294_s25] sm:$0xff]   ;;  %v343_v4 = vld [vmem:[%s276_s14] sm:$0x1]  ;;  %vm367_vm1 = vcmask 261120   ;;  %p336_p9 = scmp.lt.s32.totalorder %s956_s22, 5  ;;  %s634_s1 = sshll.u32 %s1112_s23, 1 }
  0x78   : > { %663 = vmatprep.subr.bf16.mxu1 %v902_v0  ;;  %667 = vmatprep.mubr.msk.bf16.mxu1 %vm903_vm0, %v902_v0  ;;  %v734_v5 = vld [vmem:[%s294_s25 + $0x8] sm:$0xff]   ;;  %s644_s10 = sshll.u32 %s956_s22, 5  ;;  %s335_s15 = scalar_lea.vmem [#allocation8], %s634_s1 }
  0x79   : > { %656 = vmatpush3.bf16.msra.mxu0 %v731_v1  ;;  %664 = vmatpush3.bf16.msra.mxu1 %v733_v3  ;;  %s337_s28 = scalar_select %p336_p9, %s956_s22, 5 }
  0x7a   : > { %657 = vmatprep.subr.bf16.mxu0 %v902_v0  ;;  %665 = vmatprep.subr.bf16.mxu1 %v902_v0  ;;  %s493_s6 = sshll.u32 %s335_s15, 4  ;;  %s1139_s14 = scalar_lea.hbm %s1187_s5, %s644_s10  ;;  %s1141_s6 = int_to_ptr.vmem [resolvable:$true] %s493_s6 }
  0x7b   : > { %s338_s17 = scalar_lea.vmem %s1184_s2, %s337_s28  ;;  %s341_s13 = scalar_lea.vmem %s1186_s4, %s337_s28 }
  0x7c   : > { %v635_v6 = vld [vmem:[%s338_s17] ss:$0 sm:$0xff]  ;;  %s480_s7 = scalar_lea.sflag [#allocation4], %s1112_s23  ;;  %s825_s22 = scalar_lea.vmem %s1141_s6, 32 }
  0x7d   : > { %658 = vmatpush3.bf16.msra.mxu0 %v732_v2  ;;  %666 = vmatpush3.bf16.msra.mxu1 %v734_v5  ;;  %v639_v13 = vld [vmem:[%s341_s13] ss:$0 sm:$0xff]  ;;  %p826_p3 = scmp.ne.s32.totalorder %s1141_s6, %s825_s22  ;;  %p1211_p4 = scmp.ne.s32.totalorder %s1201_s29, 0 }
  0x7e   : > { %s904_s16 = smov [#allocation8]  }
  0x7f   : > { %p827_p6 = pnand %p826_p3, %p1211_p4  ;;  %s829_s27 = sshll.u32 %s904_s16, 4  ;;  %s830_s27 = int_to_ptr.vmem [resolvable:$false] %s829_s27 }
  0x80   : > { %660 = vmatmul.mubr.msk.bf16.vlgmr.msra.gmra.mrb[0].mxu0 %vm367_vm1, %v343_v4  ;;  %s831_s11 = scalar_lea.vmem %s830_s27, 64  ;;  %p832_p2 = scmp.lt.s32.totalorder %s1141_s6, %s830_s27 }
  0x81   : > { %p828_p10 = pneg %p827_p6  ;;  %p833_p5 = scmp.lt.s32.totalorder %s831_s11, %s825_s22 }
  0x83   : > { %p834_p8 = por %p833_p5, %p832_p2 }
  0x85   : > { %p835_p7 = pnand %p834_p8, %p828_p10 }
 0x153   : > { %v405_v7 = vpop.f32.mrb[0].mxu0 }
 0x154   : > { %v406_v8 = vadd.f32 %v635_v6, %v405_v7  ;;  %v661_v9 = vpop.f32.mrb[1].mxu0 }
 0x155   : > { %v408_v10 = vpop.f32.mrb[2].mxu0 }
 0x156   : > { %v411_v11 = vpack.c.bf16 %v406_v8, %v406_v8  ;;  %v662_v12 = vpop.f32.mrb[3].mxu0 }
 0x158   : > { %668 = vmatmul.mubr.msk.bf16.vlgmr.msra.gmra.mrb[0].mxu1 %vm367_vm1, %v411_v11 }
 0x22b   : > { %v472_v14 = vpop.f32.mrb[0].mxu1 }
 0x22c   : > { %v473_v15 = vadd.f32 %v639_v13, %v472_v14  ;;  %v669_v16 = vpop.f32.mrb[1].mxu1 }
 0x22d   : > { %v475_v17 = vpop.f32.mrb[2].mxu1 }
 0x22e   : > { %478 = vst [vmem:[%s335_s15] sm:$0x3] %v473_v15  ;;  %v670_v18 = vpop.f32.mrb[3].mxu1 }
 0x22f   : > { %838 = shalt.err (!%p835_p7)
}
 0x230   : > { %s839_s23 = scalar_lea.hbm %s1139_s14, 32  ;;  %s843_s12 = scalar_lea.hbm %s1187_s5, 192 }
 0x231   : > { %p840_p13 = scmp.ne.s32.totalorder %s1139_s14, %s839_s23  ;;  %p844_p0 = scmp.lt.u32.totalorder %s1139_s14, %s1187_s5 }
 0x232   : > { %p845_p1 = scmp.lt.u32.totalorder %s843_s12, %s839_s23  ;;  %p847_p3 = scmp.lt.u32.totalorder %s839_s23, %s1139_s14 }
 0x233   : > { %p841_p12 = pnand %p840_p13, %p1211_p4 }
 0x234   : > { %p846_p9 = por %p845_p1, %p844_p0 }
 0x235   : > { %p842_p11 = pneg %p841_p12 }
 0x236   : > { %p848_p6 = por %p847_p3, %p846_p9 }
 0x238   : > { %p849_p10 = pnand %p848_p6, %p842_p11 }
 0x23a   : > { %852 = shalt.err (!%p849_p10)
}
 0x23b   : > { %677 = dma.vmem_to_hbm [thread:$0]  (%p1211_p4), %s1141_s6, 32, %s1139_s14, %s480_s7  }
 0x23c PF: > { %p694_p2 = scmp.ge.s32.totalorder %s895_s21, 2  ;;  %s505_s1 = sand.u32 1, %s883_s18  }
 0x23d   : > { %p1212_p5 = scmp.ne.s32.totalorder %s1202_s30, 0  ;;  %s506_s20 = scalar_lea.sflag [#allocation4], %s505_s1 }
 0x23f   : > { %p690_p8 = pnand %p694_p2, %p1212_p5 }
 0x241   : > { %878 = dma.done.wait (!%p690_p8), %s506_s20, 32  }
 0x242   : > { %880 = vsyncadd (!%p690_p8), %s506_s20, 4294967264  ;;  %s1213_s21 = sld [smem:[#allocation13_spill]]  ;;  %s1214_s24 = sld [smem:[#allocation12_spill]] }
 0x243   : > { %s1215_s20 = sld [smem:[#allocation14_spill]]  ;;  %s1216_s18 = smov %s887_s19 }
 0x248   : > { %p21_p7 = scmp.ge.s32.totalorder %s1213_s21, 8   ;;  %s1217_s19 = smov %s1214_s24 }
 0x24a   :  { %23 = sbr.rel (!%p21_p7) target bundleno = 9 (0x9), region = 115 }
 0x251   :  { %511 = vsyncpa [#allocation3], 1 }
 0x252   :  { %513 = vsyncpa [#allocation3 + $0x1], 1 }
 0x253   :  { %514 = vsyncpa [#allocation6], 1 }
 0x254   :  { %516 = vsyncpa [#allocation6 + $0x1], 1 }
 0x255   :  { %517 = vsyncpa [#allocation4], 1 }
 0x256   :  { %519 = vsyncpa [#allocation4 + $0x1], 1 }

</bundles_post_ra>
